<compile_context>
chip_gen: v7x
topology: tpu7x:2x2x1
jax: 0.10.0
libtpu: 0.0.40
codegen_flags: <defaults>
</compile_context>

<pallas_src>
import functools

import jax
import jax.numpy as jnp
from jax import lax
from jax.experimental import pallas as pl
from jax.experimental.pallas import tpu as pltpu

_EPS = 1e-5


def _adalin_kernel(x_ref, p_ref, o_ref, s1_ref, s2_ref, ab_ref, *,
                   hw_total, c_total):
    """Two-phase AdaLIN.

    grid = (N, phase, hw_tile); x_ref/o_ref are (C, t_hw) tiles of one batch
    element; p_ref is (C, 3) = [gamma*rho, gamma*(1-rho), beta]; s1/s2 are
    (C, 1) running sum / sum-of-squares scratch; ab_ref is the (C, 2) fused
    per-channel affine [a, b].
    """
    phase = pl.program_id(1)
    t = pl.program_id(2)
    nt = pl.num_programs(2)

    # ---- Phase 0: accumulate per-channel sum / sum-of-squares, then
    #      finalize the fused affine on the last tile. ------------------------
    @pl.when(phase == 0)
    def _():
        @pl.when(t == 0)
        def _():
            s1_ref[...] = jnp.zeros_like(s1_ref)
            s2_ref[...] = jnp.zeros_like(s2_ref)

        x = x_ref[...].astype(jnp.float32)                      # (C, t_hw)
        s1_ref[...] += jnp.sum(x, axis=-1, keepdims=True)
        s2_ref[...] += jnp.sum(x * x, axis=-1, keepdims=True)

        # Finalize at the END of phase 0 so every phase-1 step is a
        # branch-free a*x+b stream (this overlaps the prefetch of the first
        # phase-1 tile).
        @pl.when(t == nt - 1)
        def _():
            hw = jnp.float32(hw_total)
            n_all = jnp.float32(hw_total * c_total)

            s1 = s1_ref[...]                                     # (C, 1)
            s2 = s2_ref[...]                                     # (C, 1)

            # Instance norm: biased variance, eps inside rsqrt.
            mu_i = s1 / hw
            var_i = jnp.maximum(s2 / hw - mu_i * mu_i, 0.0)
            rinv_i = lax.rsqrt(var_i + _EPS)                     # (C, 1)

            # "Layer norm" as written in the module: unbiased variance over
            # (C,H,W), eps added AFTER sqrt.  Scalar reciprocal only.
            sum_l = jnp.sum(s1)
            sumsq_l = jnp.sum(s2)
            mu_l = sum_l / n_all
            denom = jnp.maximum(n_all - 1.0, 1.0)                # guard C*HW==1
            var_l = jnp.maximum((sumsq_l - n_all * mu_l * mu_l) / denom, 0.0)
            inv_l = 1.0 / (jnp.sqrt(var_l) + _EPS)               # scalar

            g_rho = p_ref[:, 0:1]                                # gamma*rho
            g_1mr = p_ref[:, 1:2]                                # gamma*(1-rho)
            beta = p_ref[:, 2:3]

            a = g_rho * rinv_i + g_1mr * inv_l
            b = beta - g_rho * (mu_i * rinv_i) - g_1mr * (mu_l * inv_l)
            ab_ref[:, 0:1] = a
            ab_ref[:, 1:2] = b

    # ---- Phase 1: branch-free streaming apply of a*x + b --------------------
    @pl.when(phase == 1)
    def _():
        a = ab_ref[:, 0:1]
        b = ab_ref[:, 1:2]
        x = x_ref[...].astype(jnp.float32)
        o_ref[...] = (a * x + b).astype(o_ref.dtype)


def _physical_vmem_bytes():
    """Per-core VMEM capacity; conservative fallback if the query fails."""
    try:
        return int(pltpu.get_tpu_info().vmem_capacity_bytes)
    except Exception:
        return 64 * 1024 * 1024   # v7x per-TC size (the smallest generation)


def _pick_tile(hw_pad, c, itemsize, phys_vmem):
    """Largest multiple-of-128 divisor of hw_pad whose (2 in + 2 out)
    double-buffered tiles fit within ~80% of physical VMEM."""
    per_elem = 4 * itemsize                      # 2 input + 2 output buffers
    fixed = 2 * 1024 * 1024                      # params/stats scratch + slack
    usable = int(phys_vmem * 0.8)
    cap_elems = max(128, ((usable - fixed) // (per_elem * c)) // 128 * 128)
    if hw_pad <= cap_elems:                      # whole slab in one tile
        return hw_pad
    for cand in range(cap_elems, 0, -128):
        if hw_pad % cand == 0:
            return cand
    return 128                                   # unreachable (hw_pad % 128 == 0)


def adalin(x, rho, gamma, beta):
    """x: (N, C, H, W) float; rho/gamma/beta: (1, C, 1, 1)."""
    N, C, H, W = x.shape
    HW = H * W
    HW_pad = ((HW + 127) // 128) * 128
    x2 = x.reshape(N, C, HW)
    if HW_pad != HW:
        # Zero-pad to a lane-dense multiple of 128: zeros contribute nothing
        # to s1/s2 (stats still divide by the true HW); pad is sliced off
        # after the call.
        x2 = jnp.pad(x2, ((0, 0), (0, 0), (0, HW_pad - HW)))

    # Grid-invariant parameter folding (wrapper-side, free) + single packed
    # (C, 3) parameter array -> one tiny DMA instead of three.
    rho_c = rho.reshape(C).astype(jnp.float32)
    gamma_c = gamma.reshape(C).astype(jnp.float32)
    beta_c = beta.reshape(C).astype(jnp.float32)
    params = jnp.stack(
        [gamma_c * rho_c, gamma_c * (1.0 - rho_c), beta_c], axis=1)  # (C, 3)

    # Generation-aware tiling / scoped-VMEM limit.
    phys_vmem = _physical_vmem_bytes()
    itemsize = jnp.dtype(x.dtype).itemsize
    t_hw = _pick_tile(HW_pad, C, itemsize, phys_vmem)
    nt = HW_pad // t_hw

    tile_io_bytes = 4 * itemsize * C * t_hw      # 2x in + 2x out buffers
    vmem_limit = min(int(phys_vmem * 0.9),
                     max(8 * 1024 * 1024, tile_io_bytes + 2 * 1024 * 1024))

    kernel = functools.partial(_adalin_kernel, hw_total=HW, c_total=C)

    out = pl.pallas_call(
        kernel,
        out_shape=jax.ShapeDtypeStruct((N, C, HW_pad), x.dtype),
        grid_spec=pltpu.PrefetchScalarGridSpec(
            num_scalar_prefetch=0,
            grid=(N, 2, nt),  # (batch, phase, spatial tile)
            in_specs=[
                # Serpentine phase order: phase 0 walks tiles 0..nt-1, phase 1
                # walks nt-1..0, so the last phase-0 tile is immediately
                # reused as the first phase-1 tile with no re-fetch (and with
                # nt == 1 the slab is DMA'd exactly once per batch element).
                pl.BlockSpec((None, C, t_hw),
                             lambda n, p, t: (n, 0, t + p * (nt - 1 - 2 * t))),
                # packed params: grid-invariant, DMA'd once.
                pl.BlockSpec((C, 3), lambda n, p, t: (0, 0)),
            ],
            # During phase 0 the output block index is pinned to tile nt-1,
            # which is exactly the block phase 1 writes first, so no
            # unwritten buffer is ever flushed.  NOTE: this relies on Pallas
            # only writing an output block back to HBM when its block index
            # changes (or at grid end) — do not reorder the grid axes or the
            # serpentine maps without rechecking this invariant.
            out_specs=pl.BlockSpec((None, C, t_hw),
                                   lambda n, p, t: (n, 0, (nt - 1) - t * p)),
            scratch_shapes=[
                pltpu.VMEM((C, 1), jnp.float32),   # s1: per-channel sum
                pltpu.VMEM((C, 1), jnp.float32),   # s2: per-channel sum of sq.
                pltpu.VMEM((C, 2), jnp.float32),   # fused affine (a, b)
            ],
        ),
        compiler_params=pltpu.CompilerParams(
            dimension_semantics=("parallel", "arbitrary", "arbitrary"),
            vmem_limit_bytes=int(vmem_limit),
        ),
    )(x2, params)

    if HW_pad != HW:
        out = out[:, :, :HW]
    return out.reshape(N, C, H, W)


def adalin_ref(x, rho, gamma, beta):
    """Pure-JAX reference mirroring the PyTorch forward (eat=False)."""
    mu_i = jnp.mean(x, axis=(2, 3), keepdims=True)
    var_i = jnp.var(x, axis=(2, 3), keepdims=True)                 # biased
    inorm = (x - mu_i) / jnp.sqrt(var_i + _EPS)

    mu_l = jnp.mean(x, axis=(1, 2, 3), keepdims=True)
    var_l = jnp.var(x, axis=(1, 2, 3), keepdims=True, ddof=1)      # unbiased
    lnorm = (x - mu_l) / (jnp.sqrt(var_l) + _EPS)

    return gamma * (rho * inorm + (1.0 - rho) * lnorm) + beta


if __name__ == "__main__":
    N, C, H, W = 2, 4, 16, 16
    key = jax.random.PRNGKey(0)
    kx, kr, kg, kb = jax.random.split(key, 4)
    x = jax.random.normal(kx, (N, C, H, W), dtype=jnp.float32)

    # Test 1: parameters exactly as AdaLIN.__init__ (eat=False):
    # rho=0, gamma=1, beta=0.
    rho0 = jnp.zeros((1, C, 1, 1), dtype=jnp.float32)
    gamma0 = jnp.ones((1, C, 1, 1), dtype=jnp.float32)
    beta0 = jnp.zeros((1, C, 1, 1), dtype=jnp.float32)
    out0 = jax.block_until_ready(adalin(x, rho0, gamma0, beta0))
    ref0 = adalin_ref(x, rho0, gamma0, beta0)
    assert out0.shape == (N, C, H, W)
    assert jnp.allclose(out0, ref0, atol=1e-5, rtol=1e-5)

    # Test 2: non-trivial rho/gamma/beta to exercise the full fused path.
    rho1 = jax.random.uniform(kr, (1, C, 1, 1), dtype=jnp.float32)
    gamma1 = jax.random.uniform(kg, (1, C, 1, 1), dtype=jnp.float32,
                                minval=0.5, maxval=1.5)
    beta1 = 0.1 * jax.random.normal(kb, (1, C, 1, 1), dtype=jnp.float32)
    out1 = jax.block_until_ready(adalin(x, rho1, gamma1, beta1))
    ref1 = adalin_ref(x, rho1, gamma1, beta1)
    assert jnp.allclose(out1, ref1, atol=1e-5, rtol=1e-5)

    # Test 3: HW not a multiple of 128 exercises the zero-pad path.
    xb = jax.random.normal(kx, (N, C, 10, 10), dtype=jnp.float32)
    out2 = jax.block_until_ready(adalin(xb, rho1, gamma1, beta1))
    ref2 = adalin_ref(xb, rho1, gamma1, beta1)
    assert out2.shape == (N, C, 10, 10)
    assert jnp.allclose(out2, ref2, atol=1e-5, rtol=1e-5)

    print("KERNEL_OK")
</pallas_src>

<mosaic_0001>
module attributes {stable_mosaic.version = 11 : i64} {
  func.func @_adalin_kernel(%arg0: i32, %arg1: i32, %arg2: i32, %arg3: memref<1x4x256xf32, #tpu.memory_space<vmem>>, %arg4: memref<4x3xf32, #tpu.memory_space<vmem>>, %arg5: memref<1x4x256xf32, #tpu.memory_space<vmem>>, %arg6: memref<4x1xf32, #tpu.memory_space<vmem>>, %arg7: memref<4x1xf32, #tpu.memory_space<vmem>>, %arg8: memref<4x2xf32, #tpu.memory_space<vmem>>) attributes {dimension_semantics = [#tpu.dimension_semantics<parallel>, #tpu.dimension_semantics<arbitrary>, #tpu.dimension_semantics<arbitrary>], iteration_bounds = array<i64: 2, 2, 1>, scalar_prefetch = 0 : i64, scratch_operands = 3 : i64, tpu.core_type = #tpu.core_type<tc>, window_params = [{transform_indices = @transform_0, window_bounds = array<i64: 1, 4, 256>}, {pipeline_mode = #tpu.pipeline_mode<synchronous>, transform_indices = @transform_1, window_bounds = array<i64: 4, 3>}, {transform_indices = @transform_2, window_bounds = array<i64: 1, 4, 256>}]} {
    %c0_i32 = arith.constant 0 : i32
    %0 = arith.cmpi eq, %arg1, %c0_i32 : i32
    %1 = arith.extui %0 : i1 to i32
    %c0_i32_0 = arith.constant 0 : i32
    %2 = arith.cmpi ne, %1, %c0_i32_0 : i32
    scf.if %2 {
      %c0_i32_2 = arith.constant 0 : i32
      %6 = arith.cmpi eq, %arg2, %c0_i32_2 : i32
      %7 = arith.extui %6 : i1 to i32
      %c0_i32_3 = arith.constant 0 : i32
      %8 = arith.cmpi ne, %7, %c0_i32_3 : i32
      scf.if %8 {
        %cst_17 = arith.constant 0.000000e+00 : f32
        %25 = vector.broadcast %cst_17 : f32 to vector<4x1xf32>
        %c0_18 = arith.constant 0 : index
        %c0_19 = arith.constant 0 : index
        %26 = vector.load %arg6[%c0_18, %c0_19] : memref<4x1xf32, #tpu.memory_space<vmem>>, vector<4x1xf32>
        tpu.vector_store %arg6[%c0_18, %c0_19], %25 {strides = array<i32>} : memref<4x1xf32, #tpu.memory_space<vmem>>, vector<4x1xf32>,
        %cst_20 = arith.constant 0.000000e+00 : f32
        %27 = vector.broadcast %cst_20 : f32 to vector<4x1xf32>
        %c0_21 = arith.constant 0 : index
        %c0_22 = arith.constant 0 : index
        %28 = vector.load %arg7[%c0_21, %c0_22] : memref<4x1xf32, #tpu.memory_space<vmem>>, vector<4x1xf32>
        tpu.vector_store %arg7[%c0_21, %c0_22], %27 {strides = array<i32>} : memref<4x1xf32, #tpu.memory_space<vmem>>, vector<4x1xf32>,
      } else {
      }
      %c0 = arith.constant 0 : index
      %c0_4 = arith.constant 0 : index
      %c0_5 = arith.constant 0 : index
      %9 = vector.load %arg3[%c0, %c0_4, %c0_5] : memref<1x4x256xf32, #tpu.memory_space<vmem>>, vector<1x4x256xf32>
      %10 = vector.shape_cast %9 : vector<1x4x256xf32> to vector<4x256xf32>
      %c0_6 = arith.constant 0 : index
      %c0_7 = arith.constant 0 : index
      %11 = vector.load %arg6[%c0_6, %c0_7] : memref<4x1xf32, #tpu.memory_space<vmem>>, vector<4x1xf32>
      %cst = arith.constant dense<0.000000e+00> : vector<4xf32>
      %12 = vector.multi_reduction <add>, %10, %cst [1] : vector<4x256xf32> to vector<4xf32>
      %13 = vector.shape_cast %12 : vector<4xf32> to vector<4x1xf32>
      %14 = arith.addf %11, %13 : vector<4x1xf32>
      %c0_8 = arith.constant 0 : index
      %c0_9 = arith.constant 0 : index
      %15 = vector.load %arg6[%c0_8, %c0_9] : memref<4x1xf32, #tpu.memory_space<vmem>>, vector<4x1xf32>
      tpu.vector_store %arg6[%c0_8, %c0_9], %14 {strides = array<i32>} : memref<4x1xf32, #tpu.memory_space<vmem>>, vector<4x1xf32>,
      %c0_10 = arith.constant 0 : index
      %c0_11 = arith.constant 0 : index
      %16 = vector.load %arg7[%c0_10, %c0_11] : memref<4x1xf32, #tpu.memory_space<vmem>>, vector<4x1xf32>
      %17 = arith.mulf %10, %10 : vector<4x256xf32>
      %cst_12 = arith.constant dense<0.000000e+00> : vector<4xf32>
      %18 = vector.multi_reduction <add>, %17, %cst_12 [1] : vector<4x256xf32> to vector<4xf32>
      %19 = vector.shape_cast %18 : vector<4xf32> to vector<4x1xf32>
      %20 = arith.addf %16, %19 : vector<4x1xf32>
      %c0_13 = arith.constant 0 : index
      %c0_14 = arith.constant 0 : index
      %21 = vector.load %arg7[%c0_13, %c0_14] : memref<4x1xf32, #tpu.memory_space<vmem>>, vector<4x1xf32>
      tpu.vector_store %arg7[%c0_13, %c0_14], %20 {strides = array<i32>} : memref<4x1xf32, #tpu.memory_space<vmem>>, vector<4x1xf32>,
      %c0_i32_15 = arith.constant 0 : i32
      %22 = arith.cmpi eq, %arg2, %c0_i32_15 : i32
      %23 = arith.extui %22 : i1 to i32
      %c0_i32_16 = arith.constant 0 : i32
      %24 = arith.cmpi ne, %23, %c0_i32_16 : i32
      scf.if %24 {
        %c0_17 = arith.constant 0 : index
        %c0_18 = arith.constant 0 : index
        %25 = vector.load %arg6[%c0_17, %c0_18] : memref<4x1xf32, #tpu.memory_space<vmem>>, vector<4x1xf32>
        %c0_19 = arith.constant 0 : index
        %c0_20 = arith.constant 0 : index
        %26 = vector.load %arg7[%c0_19, %c0_20] : memref<4x1xf32, #tpu.memory_space<vmem>>, vector<4x1xf32>
        %cst_21 = arith.constant 2.560000e+02 : f32
        %27 = vector.broadcast %cst_21 : f32 to vector<4x1xf32>
        %28 = arith.divf %25, %27 : vector<4x1xf32>
        %cst_22 = arith.constant 2.560000e+02 : f32
        %29 = vector.broadcast %cst_22 : f32 to vector<4x1xf32>
        %30 = arith.divf %26, %29 : vector<4x1xf32>
        %31 = arith.mulf %28, %28 : vector<4x1xf32>
        %32 = arith.subf %30, %31 : vector<4x1xf32>
        %cst_23 = arith.constant 0.000000e+00 : f32
        %33 = vector.broadcast %cst_23 : f32 to vector<4x1xf32>
        %34 = arith.maximumf %32, %33 : vector<4x1xf32>
        %cst_24 = arith.constant 9.99999974E-6 : f32
        %35 = vector.broadcast %cst_24 : f32 to vector<4x1xf32>
        %36 = arith.addf %34, %35 : vector<4x1xf32>
        %37 = math.rsqrt %36 : vector<4x1xf32>
        %38 = vector.shape_cast %25 : vector<4x1xf32> to vector<1x4x1xf32>
        %cst_25 = arith.constant dense<0.000000e+00> : vector<1xf32>
        %39 = vector.multi_reduction <add>, %38, %cst_25 [1, 2] : vector<1x4x1xf32> to vector<1xf32>
        %40 = vector.shape_cast %39 : vector<1xf32> to vector<1x1x1xf32>
        %41 = vector.extract %40[0, 0, 0] : f32 from vector<1x1x1xf32>
        %42 = vector.shape_cast %26 : vector<4x1xf32> to vector<1x4x1xf32>
        %cst_26 = arith.constant dense<0.000000e+00> : vector<1xf32>
        %43 = vector.multi_reduction <add>, %42, %cst_26 [1, 2] : vector<1x4x1xf32> to vector<1xf32>
        %44 = vector.shape_cast %43 : vector<1xf32> to vector<1x1x1xf32>
        %45 = vector.extract %44[0, 0, 0] : f32 from vector<1x1x1xf32>
        %cst_27 = arith.constant 1.024000e+03 : f32
        %46 = arith.divf %41, %cst_27 : f32
        %cst_28 = arith.constant 1.024000e+03 : f32
        %cst_29 = arith.constant 1.000000e+00 : f32
        %47 = arith.subf %cst_28, %cst_29 : f32
        %cst_30 = arith.constant 1.000000e+00 : f32
        %48 = arith.maximumf %47, %cst_30 : f32
        %cst_31 = arith.constant 1.024000e+03 : f32
        %49 = arith.mulf %cst_31, %46 : f32
        %50 = arith.mulf %49, %46 : f32
        %51 = arith.subf %45, %50 : f32
        %52 = arith.divf %51, %48 : f32
        %cst_32 = arith.constant 0.000000e+00 : f32
        %53 = arith.maximumf %52, %cst_32 : f32
        %54 = math.sqrt %53 : f32
        %cst_33 = arith.constant 9.99999974E-6 : f32
        %55 = arith.addf %54, %cst_33 : f32
        %cst_34 = arith.constant 1.000000e+00 : f32
        %56 = arith.divf %cst_34, %55 : f32
        %c0_35 = arith.constant 0 : index
        %c0_36 = arith.constant 0 : index
        %57 = vector.load %arg4[%c0_35, %c0_36] : memref<4x3xf32, #tpu.memory_space<vmem>>, vector<4x1xf32>
        %c0_37 = arith.constant 0 : index
        %c1 = arith.constant 1 : index
        %58 = vector.load %arg4[%c0_37, %c1] : memref<4x3xf32, #tpu.memory_space<vmem>>, vector<4x1xf32>
        %c0_38 = arith.constant 0 : index
        %c2 = arith.constant 2 : index
        %59 = vector.load %arg4[%c0_38, %c2] : memref<4x3xf32, #tpu.memory_space<vmem>>, vector<4x1xf32>
        %60 = arith.mulf %57, %37 : vector<4x1xf32>
        %61 = vector.broadcast %56 : f32 to vector<4x1xf32>
        %62 = arith.mulf %58, %61 : vector<4x1xf32>
        %63 = arith.addf %60, %62 : vector<4x1xf32>
        %64 = arith.mulf %28, %37 : vector<4x1xf32>
        %65 = arith.mulf %57, %64 : vector<4x1xf32>
        %66 = arith.subf %59, %65 : vector<4x1xf32>
        %67 = arith.mulf %46, %56 : f32
        %68 = vector.broadcast %67 : f32 to vector<4x1xf32>
        %69 = arith.mulf %58, %68 : vector<4x1xf32>
        %70 = arith.subf %66, %69 : vector<4x1xf32>
        %c0_39 = arith.constant 0 : index
        %c0_40 = arith.constant 0 : index
        %71 = vector.load %arg8[%c0_39, %c0_40] : memref<4x2xf32, #tpu.memory_space<vmem>>, vector<4x1xf32>
        tpu.vector_store %arg8[%c0_39, %c0_40], %63 {strides = array<i32>} : memref<4x2xf32, #tpu.memory_space<vmem>>, vector<4x1xf32>,
        %c0_41 = arith.constant 0 : index
        %c1_42 = arith.constant 1 : index
        %72 = vector.load %arg8[%c0_41, %c1_42] : memref<4x2xf32, #tpu.memory_space<vmem>>, vector<4x1xf32>
        tpu.vector_store %arg8[%c0_41, %c1_42], %70 {strides = array<i32>} : memref<4x2xf32, #tpu.memory_space<vmem>>, vector<4x1xf32>,
      } else {
      }
    } else {
    }
    %c1_i32 = arith.constant 1 : i32
    %3 = arith.cmpi eq, %arg1, %c1_i32 : i32
    %4 = arith.extui %3 : i1 to i32
    %c0_i32_1 = arith.constant 0 : i32
    %5 = arith.cmpi ne, %4, %c0_i32_1 : i32
    scf.if %5 {
      %c0 = arith.constant 0 : index
      %c0_2 = arith.constant 0 : index
      %6 = vector.load %arg8[%c0, %c0_2] : memref<4x2xf32, #tpu.memory_space<vmem>>, vector<4x1xf32>
      %c0_3 = arith.constant 0 : index
      %c1 = arith.constant 1 : index
      %7 = vector.load %arg8[%c0_3, %c1] : memref<4x2xf32, #tpu.memory_space<vmem>>, vector<4x1xf32>
      %c0_4 = arith.constant 0 : index
      %c0_5 = arith.constant 0 : index
      %c0_6 = arith.constant 0 : index
      %8 = vector.load %arg3[%c0_4, %c0_5, %c0_6] : memref<1x4x256xf32, #tpu.memory_space<vmem>>, vector<1x4x256xf32>
      %9 = vector.shape_cast %8 : vector<1x4x256xf32> to vector<4x256xf32>
      %10 = vector.broadcast %6 : vector<4x1xf32> to vector<4x256xf32>
      %11 = arith.mulf %10, %9 : vector<4x256xf32>
      %12 = vector.broadcast %7 : vector<4x1xf32> to vector<4x256xf32>
      %13 = arith.addf %11, %12 : vector<4x256xf32>
      %c0_7 = arith.constant 0 : index
      %c0_8 = arith.constant 0 : index
      %c0_9 = arith.constant 0 : index
      %14 = vector.load %arg5[%c0_7, %c0_8, %c0_9] : memref<1x4x256xf32, #tpu.memory_space<vmem>>, vector<1x4x256xf32>
      %15 = vector.shape_cast %14 : vector<1x4x256xf32> to vector<4x256xf32>
      %16 = vector.shape_cast %13 : vector<4x256xf32> to vector<1x4x256xf32>
      tpu.vector_store %arg5[%c0_7, %c0_8, %c0_9], %16 {strides = array<i32>} : memref<1x4x256xf32, #tpu.memory_space<vmem>>, vector<1x4x256xf32>,
    } else {
    }
    return
  }
  func.func @transform_0(%arg0: i32, %arg1: i32, %arg2: i32) -> (i32, i32, i32) {
    %c2_i32 = arith.constant 2 : i32
    %0 = arith.muli %c2_i32, %arg2 : i32
    %c0_i32 = arith.constant 0 : i32
    %1 = arith.subi %c0_i32, %0 : i32
    %2 = arith.muli %arg1, %1 : i32
    %3 = arith.addi %arg2, %2 : i32
    %c0_i32_0 = arith.constant 0 : i32
    %c0_i32_1 = arith.constant 0 : i32
    return %arg0, %c0_i32_0, %3 : i32, i32, i32
  }
  func.func @transform_1(%arg0: i32, %arg1: i32, %arg2: i32) -> (i32, i32) {
    %c0_i32 = arith.constant 0 : i32
    %c0_i32_0 = arith.constant 0 : i32
    %c0_i32_1 = arith.constant 0 : i32
    return %c0_i32, %c0_i32_0 : i32, i32
  }
  func.func @transform_2(%arg0: i32, %arg1: i32, %arg2: i32) -> (i32, i32, i32) {
    %0 = arith.muli %arg2, %arg1 : i32
    %c0_i32 = arith.constant 0 : i32
    %1 = arith.subi %c0_i32, %0 : i32
    %c0_i32_0 = arith.constant 0 : i32
    %c0_i32_1 = arith.constant 0 : i32
    return %arg0, %c0_i32_0, %1 : i32, i32, i32
  }
}

</mosaic_0001>

<bundles_post_ra>
// kernel: tpu_custom_call.1
= control target key start
LH: loop header
LB: loop body
LE: loop exit
PB: predicated region body
PF: predicated region fallthrough
CT: control target
= control target key end

     0   :  { %7 = vsyncpa [#allocation6], 0  ;;  %s1054_s0 = inlined_call_operand.hbm [shape: f32[2,4,256], index: 0, kind: input, shape index: {}]   ;;  %s1055_s1 = inlined_call_operand.hbm [shape: f32[4,3], index: 1, kind: input, shape index: {}]   ;;  %s1056_s2 = inlined_call_operand.hbm [shape: f32[2,4,256], index: 2, kind: output, shape index: {}]  }
   0x1   :  { %9 = vsyncpa [#allocation6 + $0x1], 0 }
   0x2   :  { %10 = vsyncpa [#allocation9], 0 }
   0x3   :  { %11 = vsyncpa [#allocation7], 0 }
   0x4   :  { %13 = vsyncpa [#allocation7 + $0x1], 0  ;;  %s815_s9 = smov 0   ;;  %s817_s10 = smov 0  }
   0x5   :  { %s819_s11 = smov 0   ;;  %s821_s12 = smov 0  }
   0x6   :  { %s823_s13 = smov 0   ;;  %s825_s14 = smov 0  }
   0x7   :  { %s827_s15 = smov 0   ;;  %s829_s16 = smov 0  }
   0x8 LB: > { %s493_s17 = sadd.s32 4294967295, %s788_s16   ;;  %s494_s18 = sadd.s32 4294967294, %s788_s16   ;;  %s788_s16 = sphi %s829_s16, %s19_s16   ;;  %s784_s15 = sphi %s827_s15, %s1080_s15   ;;  %s780_s14 = sphi %s825_s14, %s1079_s14   ;;  %s776_s13 = sphi %s823_s13, %s1078_s13   ;;  %s772_s12 = sphi %s821_s12, %s1077_s12   ;;  %s768_s11 = sphi %s819_s11, %s1076_s11   ;;  %s764_s10 = sphi %s817_s10, %s1075_s10   ;;  %s760_s9 = sphi %s815_s9, %s1074_s9  }
   0x9   : > { %p68_p0 = scmp.ne.s32.totalorder %s764_s10, %s760_s9  ;;  %p859_p1 = scmp.eq.s32.totalorder %s493_s17, 0 }
   0xa   : > { %p863_p2 = scmp.eq.s32.totalorder %s493_s17, 3  ;;  %p125_p3 = scmp.eq.s32.totalorder %s494_s18, 3 }
   0xb   : > { %s1061_s19 = scalar_select %p859_p1, 1, 0 }
   0xc   : > { %s1062_s20 = scalar_select %p863_p2, 1, 0 }
   0xd   : > { %p869_p4 = por %p859_p1, %p68_p0  ;;  %p495_p5 = scmp.ge.s32.totalorder %s788_s16, 1 }
   0xe   : > { %p874_p6 = por %p125_p3, %p68_p0  ;;  %p132_p7 = scmp.lt.s32.totalorder %s788_s16, 5 }
   0xf   : > { %s1063_s21 = scalar_select %p869_p4, 1, 0 }
  0x10   : > { %s1064_s22 = scalar_select %p874_p6, 1, 0 }
  0x11   : > { %p879_p8 = pnand %p495_p5, %p132_p7  ;;  %s790_s24 = smov [#allocation8]  }
  0x12   : > { %s145_s25 = sshll.u32 %s790_s24, 4  ;;  %s34_s27 = sadd.s32 1, %s780_s14  ;;  %s146_s25 = int_to_ptr.vmem [resolvable:$true] %s145_s25 }
  0x13   : > { %s1065_s23 = scalar_select %p879_p8, 1, 0 }
  0x14   : > { %p530_p9 = pneg %p879_p8  ;;  %s628_s30 = scalar_lea.hbm %s1055_s1, 64 }
  0x15   : > { %p629_p11 = scmp.ne.s32.totalorder %s1055_s1, %s628_s30  ;;  %p635_p3 = scmp.lt.u32.totalorder %s628_s30, %s1055_s1 }
  0x16   : > { %p887_p10 = pnand %p530_p9, %p859_p1 }
  0x18   : > { %p630_p12 = pneg %p887_p10 }
  0x1a   : > { %p631_p13 = pnand %p630_p12, %p629_p11 }
  0x1c   : > { %p632_p0 = pneg %p631_p13 }
  0x1e   : > { %p637_p5 = pnand %p635_p3, %p632_p0 }
  0x20   : > { %640 = shalt.err (!%p637_p5)
}
  0x21   : > { %s641_s7 = scalar_lea.vmem %s146_s25, 64  ;;  %p649_p1 = scmp.lt.s32.totalorder %s146_s25, %s146_s25 }
  0x22   : > { %p642_p7 = scmp.ne.s32.totalorder %s146_s25, %s641_s7  ;;  %p650_p4 = scmp.lt.s32.totalorder %s641_s7, %s641_s7 }
  0x24   : > { %p644_p9 = pnand %p642_p7, %p630_p12  ;;  %p651_p8 = por %p650_p4, %p649_p1 }
  0x26   : > { %p645_p6 = pneg %p644_p9 }
  0x28   : > { %p652_p2 = pnand %p651_p8, %p645_p6 }
  0x2a   : > { %655 = shalt.err (!%p652_p2)
}
  0x2b   : > { %533 = dma.hbm_to_vmem [thread:$0]  (!%p887_p10), %s1055_s1, 64, %s146_s25, [#allocation9]  }
  0x2c   : > { %p36_p11 = scmp.ge.s32.totalorder %s34_s27, 2  ;;  %s38_s18 = sadd.s32 1, %s784_s15 }
  0x2d   : > { %s55_s24 = sadd.s32 1, %s768_s11  ;;  %p62_p1 = scmp.ne.s32.totalorder %s768_s11, %s764_s10 }
  0x2e   : > { %s1082_s27 = smov (%p36_p11, %s34_s27), 0  ;;  %s1084_s18 = smov (!%p36_p11, %s38_s18), %s784_s15 }
  0x2f   : > { %p63_p2 = scmp.eq.s32.totalorder %s788_s16, 0  ;;  %p1067_p4 = scmp.ne.s32.totalorder %s1062_s20, 0 }
  0x30   : > { %p40_p8 = scmp.ge.s32.totalorder %s1084_s18, 2  ;;  %p543_p12 = scmp.lt.s32.totalorder %s788_s16, 4 }
  0x31   : > { %p918_p6 = por %p1067_p4, %p62_p1  ;;  %p64_p13 = por %p63_p2, %p62_p1 }
  0x32   : > { %s156_s25 = sand.u32 1, %s768_s11   ;;  %s1086_s18 = smov (%p40_p8, %s1084_s18), 0 }
  0x33   : > { %s498_s28 = sshll.u32 %s156_s25, 3  ;;  %s50_s29 = ssub.s32 %s784_s15, %s1086_s18 }
  0x34   : > { %p53_p10 = scmp.eq.s32.totalorder %s50_s29, 0  ;;  %s512_s30 = sshll.u32 %s784_s15, 7 }
  0x35   : > { %s932_s20 = scalar_lea.hbm %s1054_s0, %s512_s30  ;;  %s160_s5 = scalar_lea.vmem [#allocation5], %s498_s28 }
  0x36   : > { %s174_s6 = sshll.u32 %s160_s5, 4  ;;  %p941_p0 = pnand %p543_p12, %p64_p13  ;;  %s937_s6 = int_to_ptr.vmem [resolvable:$true] %s174_s6 }
  0x37   : > { %s935_s7 = scalar_select %p53_p10, %s768_s11, %s55_s24  }
  0x38   : > { %s157_s17 = scalar_lea.sflag [#allocation6], %s156_s25  ;;  %s656_s29 = scalar_lea.hbm %s932_s20, 128 }
  0x39   : > { %p657_p3 = scmp.ne.s32.totalorder %s932_s20, %s656_s29  ;;  %p658_p5 = pneg %p941_p0 }
  0x3a   : > { %s661_s30 = scalar_lea.hbm %s1054_s0, 256  ;;  %p662_p11 = scmp.lt.u32.totalorder %s932_s20, %s1054_s0 }
  0x3b   : > { %p659_p7 = pnand %p658_p5, %p657_p3  ;;  %p663_p1 = scmp.lt.u32.totalorder %s661_s30, %s656_s29 }
  0x3c   : > { %p665_p4 = scmp.lt.u32.totalorder %s656_s29, %s932_s20 }
  0x3d   : > { %p660_p9 = pneg %p659_p7  ;;  %p664_p2 = por %p663_p1, %p662_p11 }
  0x3f   : > { %p666_p8 = por %p665_p4, %p664_p2 }
  0x41   : > { %p667_p12 = pnand %p666_p8, %p660_p9 }
  0x43   : > { %670 = shalt.err (!%p667_p12)
}
  0x44   : > { %s671_s25 = scalar_lea.vmem %s937_s6, 128  ;;  %s791_s5 = smov [#allocation5]  }
  0x45   : > { %p672_p13 = scmp.ne.s32.totalorder %s937_s6, %s671_s25  ;;  %s676_s24 = sshll.u32 %s791_s5, 4  ;;  %s677_s24 = int_to_ptr.vmem [resolvable:$false] %s676_s24 }
  0x46   : > { %s678_s28 = scalar_lea.vmem %s677_s24, 256  ;;  %p679_p7 = scmp.lt.s32.totalorder %s937_s6, %s677_s24 }
  0x47   : > { %p674_p10 = pnand %p672_p13, %p658_p5  ;;  %p680_p11 = scmp.lt.s32.totalorder %s678_s28, %s671_s25 }
  0x49   : > { %p675_p3 = pneg %p674_p10  ;;  %p681_p1 = por %p680_p11, %p679_p7 }
  0x4b   : > { %p682_p2 = pnand %p681_p1, %p675_p3 }
  0x4d   : > { %685 = shalt.err (!%p682_p2)
}
  0x4e   : > { %537 = dma.hbm_to_vmem [thread:$0]  (!%p941_p0), %s932_s20, 128, %s937_s6, %s157_s17  }
  0x4f   : > { %p1070_p9 = scmp.ne.s32.totalorder %s1065_s23, 0 }
  0x50   : > { %s973_s29 = sand.u32 (!%p1070_p9), 1, %s764_s10   ;;  %p1071_p5 = scmp.ne.s32.totalorder (!%p1070_p9), %s1063_s21, 0 }
  0x51   : > { %183 = sbr.rel (%p1070_p9) target bundleno = 1004 (0x3ec), region = 28  ;;  %s502_s30 = sshll.u32 (!%p1070_p9), %s973_s29, 3 }
  0x52   : > { %s186_s3 = scalar_lea.sflag (!%p1070_p9), [#allocation6], %s973_s29  ;;  %s977_s4 = scalar_lea.vmem (!%p1070_p9), [#allocation5], %s502_s30 }
  0x58   : > { %747 = dma.done.wait (%p1071_p5), %s186_s3, 128  }
  0x59   : > { %749 = vsyncadd (%p1071_p5), %s186_s3, 4294967168  ;;  %p1072_p0 = scmp.ne.s32.totalorder %s1061_s19, 0 }
  0x5b   : > { %751 = dma.done.wait (%p1072_p0), [#allocation9], 64  }
  0x5c   : > { %753 = vsyncadd (%p1072_p0), [#allocation9], 4294967232  ;;  %s987_s23 = scalar_lea.vmem [#allocation10], %s502_s30  ;;  %p505_p4 = scmp.ne.s32.totalorder %s772_s12, 0 }
  0x5d   : > { %v233_v0 = vld [vmem:[%s977_s4] sm:$0xff] (!%p505_p4)  ;;  %vm238_vm0 = vcmask (!%p505_p4), 1043456   ;;  %vm230_vm1 = vcmask (!%p505_p4), 3072   ;;  %v792_v10 = vmov (!%p505_p4), 0.0   ;;  %v315_v29 = vld [vmem:[#allocation8] sm:$0xf] (!%p505_p4) }
  0x5e   : > { %225 = sbr.rel (%p505_p4) target bundleno = 835 (0x343), region = 40  ;;  %v236_v1 = vcombine.high (!%p505_p4), %v233_v0, %v233_v0  ;;  %v239_v2 = vsel (!%p505_p4), %vm238_vm0, %v233_v0, 0.0  ;;  %v248_v3 = vmul.f32 (!%p505_p4), %v233_v0, %v233_v0  ;;  %231 = vst.msk [vmem:[#allocation2] sm:$0xf] (!%p505_p4), %vm230_vm1, %v792_v10  ;;  %232 = vst.msk [vmem:[#allocation3] sm:$0xf] (!%p505_p4), %vm230_vm1, %v792_v10 }
  0x5f   : > { %s793_s19 = smov (!%p505_p4), 2   ;;  %s794_s24 = smov (!%p505_p4), 0.0   ;;  %vm344_vm4 = vcmask (!%p505_p4), 11272  }
  0x60   : > { %v240_v4 = vsel (!%p505_p4), %vm238_vm0, %v236_v1, 0.0  ;;  %v250_v5 = vcombine.high (!%p505_p4), %v248_v3, %v248_v3  ;;  %v252_v6 = vsel (!%p505_p4), %vm238_vm0, %v248_v3, 0.0 }
  0x61   : > { %v241_v7 = vadd.f32 (!%p505_p4), %v240_v4, %v239_v2 }
  0x62   : > { %v253_v8 = vsel (!%p505_p4), %vm238_vm0, %v250_v5, 0.0 }
  0x63   : > { %242 = vadd.xlane.f32.xlu0 (!%p505_p4), %v241_v7  ;;  %v254_v9 = vadd.f32 (!%p505_p4), %v253_v8, %v252_v6 }
  0x65   : > { %v234_v11 = vld [vmem:[#allocation2] sm:$0xf]  ;;  %v247_v14 = vld [vmem:[#allocation3] sm:$0xf] }
  0x67   : > { %255 = vadd.xlane.f32.xlu0 %v254_v9 }
  0xf0   : > { %v243_v12 = vpop.xlane.xlu0 %242 }
  0xf1   : > { %v244_v13 = vadd.f32 %v243_v12, %v234_v11 }
  0xf3   : > { %246 = vst.msk [vmem:[#allocation2] sm:$0xf] %vm230_vm1, %v244_v13 }
  0xf4   : > { %v256_v15 = vpop.xlane.xlu0 %255 }
  0xf5   : > { %v257_v16 = vadd.f32 %v256_v15, %v247_v14 }
  0xf7   : > { %258 = vst.msk [vmem:[#allocation3] sm:$0xf] %vm230_vm1, %v257_v16 }
  0xfa   : > { %v262_v17 = vld [vmem:[#allocation2] sm:$0xf] }
  0xfb   : > { %v272_v18 = vsel %vm230_vm1, %v262_v17, 0.0  ;;  %v265_v19 = vmul.f32 0.00390625, %v262_v17 }
  0xfc   : > { %273 = vadd.xlane.f32.xlu1 %v272_v18 }
  0xfd   : > { %v267_v21 = vmul.f32 %v265_v19, %v265_v19 }
  0xfe   : > { %v263_v20 = vld [vmem:[#allocation3] sm:$0xf] }
  0xff   : > { %v266_v22 = vmul.f32 0.00390625, %v263_v20  ;;  %v282_v23 = vsel %vm230_vm1, %v263_v20, 0.0 }
 0x100   : > { %283 = vadd.xlane.f32.xlu1 %v282_v23 }
 0x101   : > { %v268_v24 = vsub.f32 %v266_v22, %v267_v21 }
 0x103   : > { %v269_v25 = vmax.f32 %v268_v24, 0.0 }
 0x105   : > { %v270_v26 = vadd.f32 1e-05, %v269_v25 }
 0x107   : > { %619 = vrsqrt.f32 %v270_v26 }
 0x111   : > { %v620_v27 = vpop.eup %619 }
 0x112   : > { %v324_v28 = vmul.f32 %v620_v27, %v265_v19  ;;  %v316_v61 = vmul.f32 %v620_v27, %v315_v29 }
 0x114   : > { %v325_v30 = vmul.f32 %v324_v28, %v315_v29 }
 0x116   : > { %327 = vrot.lane.b32.xlu0 %v325_v30, %s793_s19 }
 0x188   : > { %v328_v57 = vpop.permute.xlu0 %327 }
 0x189   : > { %v274_v31 = vpop.xlane.xlu1 %273  ;;  %v330_v58 = vsub.f32 %v315_v29, %v328_v57 }
 0x18a   : > { %v275_v32 = vrot.slane %v274_v31, 4 }
 0x18c   : > { %v276_v33 = vadd.f32 %v275_v32, %v274_v31 }
 0x18d   : > { %v284_v34 = vpop.xlane.xlu1 %283 }
 0x18e   : > { %v277_v35 = vrot.slane %v276_v33, 2  ;;  %v285_v36 = vrot.slane %v284_v34, 4 }
 0x190   : > { %v286_v37 = vadd.f32 %v285_v36, %v284_v34  ;;  %v278_v38 = vadd.f32 %v277_v35, %v276_v33 }
 0x192   : > { %v287_v39 = vrot.slane %v286_v37, 2  ;;  %v279_v40 = vrot.slane %v278_v38, 1 }
 0x194   : > { %v280_v41 = vadd.f32 %v279_v40, %v278_v38  ;;  %v288_v42 = vadd.f32 %v287_v39, %v286_v37 }
 0x196   : > { %514 = vpush %v280_v41  ;;  %v289_v43 = vrot.slane %v288_v42, 1 }
 0x198   : > { %v290_v44 = vadd.f32 %v289_v43, %v288_v42 }
 0x19a   : > { %516 = vpush %v290_v44 }
 0x1c7   : > { %s515_s21 = spop %514 }
 0x1c8   : > { %s294_s20 = smul.f32 0.0009765625, %s515_s21 }
 0x1ca   : > { %s295_s6 = smul.f32 1024.0, %s294_s20 }
 0x1cb   : > { %s517_s17 = spop %516 }
 0x1cc   : > { %s296_s8 = smul.f32 %s295_s6, %s294_s20  ;;  %s795_s6 = smov 1  }
 0x1ce   : > { %s297_s25 = ssub.f32 %s517_s17, %s296_s8  ;;  %s796_s8 = smov 127  }
 0x1d0   : > { %s300_s5 = smul.f32 0.0009775171, %s297_s25 }
 0x1d2   : > { %s301_s28 = smax.f32 %s794_s24, %s300_s5 }
 0x1d3   : > { %v302_v45 = vstv %s301_s28 }
 0x1d4   : > { %621 = vrsqrt.f32 %v302_v45  ;;  %vm305_vm2 = vcmp.eq.f32.partialorder %v302_v45, inf  ;;  %v308_v48 = vand.u32 2147483648, %v302_v45  ;;  %vm307_vm3 = vcmp.eq.f32.partialorder %v302_v45, 0.0 }
 0x1de   : > { %v622_v46 = vpop.eup %621 }
 0x1df   : > { %v304_v47 = vmul.f32 %v622_v46, %v302_v45 }
 0x1e1   : > { %v306_v49 = vsel %vm305_vm2, %v302_v45, %v304_v47 }
 0x1e2   : > { %v309_v50 = vsel %vm307_vm3, %v308_v48, %v306_v49 }
 0x1e3   : > { %518 = vpush %v309_v50 }
 0x214   : > { %s519_s30 = spop %518 }
 0x215   : > { %s311_s3 = sadd.f32 1e-05, %s519_s30 }
 0x217   : > { %v312_v51 = vstv %s311_s3 }
 0x218   : > { %623 = vrcp.f32 %v312_v51 }
 0x222   : > { %v624_v52 = vpop.eup %623 }
 0x223   : > { %520 = vpush %v624_v52 }
 0x254   : > { %s521_s19 = spop %520 }
 0x255   : > { %s331_s21 = smul.f32 %s521_s19, %s294_s20  ;;  %v317_v55 = vstv %s521_s19 }
 0x256   : > { %v318_v56 = vmul.f32 %v317_v55, %v315_v29 }
 0x257   : > { %v332_v53 = vstv %s331_s21 }
 0x258   : > { %v333_v54 = vmul.f32 %v332_v53, %v315_v29 }
 0x25a   : > { %335 = vrot.lane.b32.xlu1 %v333_v54, %s795_s6 }
 0x25e   : > { %320 = vrot.lane.b32.xlu1 %v318_v56, %s796_s8 }
 0x2cc   : > { %v336_v59 = vpop.permute.xlu1 %335 }
 0x2cd   : > { %v338_v60 = vsub.f32 %v330_v58, %v336_v59 }
 0x2cf   : > { %341 = vrot.lane.b32.xlu1 %v338_v60, %s796_s8 }
 0x2d0   : > { %v321_v62 = vpop.permute.xlu1 %320 }
 0x2d1   : > { %v323_v63 = vadd.f32 %v321_v62, %v316_v61 }
 0x2d3   : > { %339 = vst.msk [vmem:[#allocation4] sm:$0xf] %vm230_vm1, %v323_v63 }
 0x341   : > { %v342_v0 = vpop.permute.xlu1 %341 }
 0x342   : > { %345 = vst.msk [vmem:[#allocation4] sm:$0xf] %vm344_vm4, %v342_v0 }
 0x343 PF: > { %p506_p8 = scmp.ne.s32.totalorder %s772_s12, 1 }
 0x344   : > { %v797_v2 = vmov (!%p506_p8), 0   ;;  %v798_v3 = vmov (!%p506_p8), 1   ;;  %v351_v4 = vld [vmem:[%s977_s4] sm:$0xff] (!%p506_p8) }
 0x345   : > { %349 = sbr.rel (%p506_p8) target bundleno = 980 (0x3d4), region = 52  ;;  %625 = vset.pattern.permute.xlu0 (!%p506_p8), %v797_v2  ;;  %v358_v5 = vcombine.high (!%p506_p8), %v351_v4, %v351_v4 }
 0x349   : > { %v350_v1 = vld [vmem:[#allocation4] sm:$0xf] (!%p506_p8) }
 0x34a   : > { %354 = vperm.xlu0 (!%p506_p8), %625, %v350_v1  }
 0x34e   : > { %626 = vset.pattern.permute.xlu0 %v798_v3 }
 0x34f   : > { %363 = vperm.xlu0 %626, %v350_v1  }
 0x3c9   : > { %v355_v6 = vpop.permute.xlu0 %354 }
 0x3ca   : > { %v360_v7 = vmul.f32 %v355_v6, %v351_v4  ;;  %v361_v8 = vmul.f32 %v358_v5, %v355_v6 }
 0x3ce   : > { %v364_v9 = vpop.permute.xlu0 %363 }
 0x3cf   : > { %v366_v10 = vadd.f32 %v364_v9, %v360_v7  ;;  %v367_v11 = vadd.f32 %v364_v9, %v361_v8 }
 0x3d1   : > { %v370_v12 = vcombine.low %v366_v10, %v367_v11 }
 0x3d3   : > { %372 = vst [vmem:[%s987_s23] sm:$0xff] %v370_v12 }
 0x3d4 PF: > { %s513_s12 = sshll.u32 %s776_s13, 7  ;;  %s392_s4 = sshll.u32 %s987_s23, 4  ;;  %s393_s4 = int_to_ptr.vmem [resolvable:$true] %s392_s4 }
 0x3d5   : > { %s1005_s25 = scalar_lea.hbm %s1056_s2, %s513_s12  ;;  %s374_s5 = scalar_lea.sflag [#allocation7], %s973_s29 }
 0x3d6   : > { %s686_s24 = scalar_lea.vmem %s393_s4, 128  ;;  %s799_s28 = smov [#allocation10]  }
 0x3d7   : > { %p687_p12 = scmp.ne.s32.totalorder %s393_s4, %s686_s24  ;;  %s690_s30 = sshll.u32 %s799_s28, 4  ;;  %s691_s30 = int_to_ptr.vmem [resolvable:$false] %s690_s30 }
 0x3d8   : > { %s692_s3 = scalar_lea.vmem %s691_s30, 256  ;;  %p693_p3 = scmp.lt.s32.totalorder %s393_s4, %s691_s30 }
 0x3d9   : > { %p688_p13 = pnand %p687_p12, %p918_p6  ;;  %p694_p7 = scmp.lt.s32.totalorder %s692_s3, %s686_s24 }
 0x3db   : > { %p689_p10 = pneg %p688_p13  ;;  %p695_p11 = por %p694_p7, %p693_p3 }
 0x3dd   : > { %p696_p1 = pnand %p695_p11, %p689_p10 }
 0x3df   : > { %699 = shalt.err (!%p696_p1)
}
 0x3e0   : > { %s700_s13 = scalar_lea.hbm %s1005_s25, 128  ;;  %s704_s19 = scalar_lea.hbm %s1056_s2, 256 }
 0x3e1   : > { %p701_p2 = scmp.ne.s32.totalorder %s1005_s25, %s700_s13  ;;  %p705_p0 = scmp.lt.u32.totalorder %s1005_s25, %s1056_s2 }
 0x3e2   : > { %p706_p4 = scmp.lt.u32.totalorder %s704_s19, %s700_s13  ;;  %p708_p12 = scmp.lt.u32.totalorder %s700_s13, %s1005_s25 }
 0x3e3   : > { %p702_p9 = pnand %p701_p2, %p918_p6 }
 0x3e4   : > { %p707_p8 = por %p706_p4, %p705_p0 }
 0x3e5   : > { %p703_p5 = pneg %p702_p9 }
 0x3e6   : > { %p709_p13 = por %p708_p12, %p707_p8 }
 0x3e8   : > { %p710_p10 = pnand %p709_p13, %p703_p5 }
 0x3ea   : > { %713 = shalt.err (!%p710_p10)
}
 0x3eb   : > { %528 = dma.vmem_to_hbm [thread:$0]  (%p918_p6), %s393_s4, 128, %s1005_s25, %s374_s5  }
 0x3ec PF: > { %p545_p3 = scmp.ge.s32.totalorder %s788_s16, 2  ;;  %s404_s8 = sand.u32 1, %s760_s9  }
 0x3ed   : > { %p1073_p7 = scmp.ne.s32.totalorder %s1064_s22, 0  ;;  %s405_s12 = scalar_lea.sflag [#allocation7], %s404_s8 }
 0x3ef   : > { %p539_p11 = pnand %p545_p3, %p1073_p7 }
 0x3f1   : > { %755 = dma.done.wait (!%p539_p11), %s405_s12, 128  }
 0x3f2   : > { %757 = vsyncadd (!%p539_p11), %s405_s12, 4294967168  ;;  %s19_s16 = sadd.s32 1, %s788_s16   ;;  %s1074_s9 = smov %s764_s10 }
 0x3f3   : > { %p16_p1 = scmp.ge.s32.totalorder %s19_s16, 6   ;;  %s1075_s10 = smov %s768_s11 }
 0x3f4   : > { %s1076_s11 = smov %s935_s7  ;;  %s1077_s12 = smov %s780_s14 }
 0x3f5   : > { %s1078_s13 = smov %s784_s15  ;;  %s1079_s14 = smov %s1082_s27 }
 0x3f6   : > { %s1080_s15 = smov %s1086_s18  ;;  %18 = sbr.rel (!%p16_p1) target bundleno = 8 (0x8), region = 93 }
 0x3fd   :  { %410 = vsyncpa [#allocation6], 1 }
 0x3fe   :  { %412 = vsyncpa [#allocation6 + $0x1], 1 }
 0x3ff   :  { %413 = vsyncpa [#allocation9], 1 }
 0x400   :  { %414 = vsyncpa [#allocation7], 1 }
 0x401   :  { %416 = vsyncpa [#allocation7 + $0x1], 1 }

</bundles_post_ra>
